<compile_context>
chip_gen: v7x
topology: tpu7x:2x2x1
jax: 0.10.0
libtpu: 0.0.40
codegen_flags: <defaults>
</compile_context>

<pallas_src>
import functools

import jax
import jax.numpy as jnp
from jax.experimental import pallas as pl
from jax.experimental.pallas import tpu as pltpu


def _encoder_kernel(idx_ref, w_ref, o_ref, *, num_features, d_pad):
    # idx_ref: (tm, F) int32 -- indices already offset into the packed table
    # w_ref:   (D_pad, E) bf16 -- packed embedding tables
    # o_ref:   (tm, E) f32
    idx = idx_ref[...]                                     # (tm, F)
    tm = idx.shape[0]
    iota = jax.lax.broadcasted_iota(jnp.int32, (tm, d_pad), 1)

    # Summed one-hot: onehot[n, d] = sum_f [idx[n, f] == d].
    # Features index disjoint row ranges of the packed table, so one matmul
    # reproduces sum_f W_f[x[:, f]].  Accumulate in int32, convert once.
    onehot_i = jnp.zeros((tm, d_pad), jnp.int32)
    for f in range(num_features):
        onehot_i = onehot_i + (iota == idx[:, f:f + 1]).astype(jnp.int32)
    onehot = onehot_i.astype(w_ref.dtype)                  # 0/1 exact in bf16

    o_ref[...] = jnp.dot(onehot, w_ref[...],
                         preferred_element_type=jnp.float32)


def mul_onehot_encoder(idx_offset, w_packed, *, tm=128):
    """idx_offset: (N, F) int32 with per-feature row offsets already added.
       w_packed:   (D_pad, E) bf16 packed embedding tables.
       Returns (N, E) float32 summed embeddings."""
    n, num_features = idx_offset.shape
    d_pad, embed_dim = w_packed.shape

    # Pad N up to a tile multiple; padded rows use index 0 (valid) and are
    # discarded after the call.
    n_pad = tm * pl.cdiv(n, tm)
    if n_pad != n:
        idx_offset = jnp.pad(idx_offset, ((0, n_pad - n), (0, 0)))

    kernel = functools.partial(_encoder_kernel,
                               num_features=num_features, d_pad=d_pad)

    out = pl.pallas_call(
        kernel,
        out_shape=jax.ShapeDtypeStruct((n_pad, embed_dim), jnp.float32),
        grid_spec=pltpu.PrefetchScalarGridSpec(
            num_scalar_prefetch=0,
            grid=(n_pad // tm,),
            in_specs=[
                pl.BlockSpec((tm, num_features), lambda i: (i, 0)),
                # Constant block index: DMA'd once, resident across the grid.
                pl.BlockSpec((d_pad, embed_dim), lambda i: (0, 0)),
            ],
            out_specs=pl.BlockSpec((tm, embed_dim), lambda i: (i, 0)),
        ),
        compiler_params=pltpu.CompilerParams(
            dimension_semantics=("parallel",)),
    )(idx_offset, w_packed)
    return out[:n]


def get_feature_dims():
    # Synthetic feature cardinalities (would come from the dataset in gcn.py).
    return [7, 5, 9, 11]


def build_packed_weights(key, feature_dims, embed_dim, d_pad):
    """Xavier-uniform init per table (matches nn.init.xavier_uniform_),
    packed row-wise into one (d_pad, embed_dim) f32 matrix.
    Returns (W_f32, offsets, per-table list)."""
    tables = []
    for i, dim in enumerate(feature_dims):
        k = jax.random.fold_in(key, i)
        bound = (6.0 / (dim + embed_dim)) ** 0.5
        tables.append(jax.random.uniform(k, (dim, embed_dim),
                                         jnp.float32, -bound, bound))
    total = sum(feature_dims)
    w = jnp.concatenate(tables, axis=0)
    w = jnp.pad(w, ((0, d_pad - total), (0, 0)))
    offsets = jnp.array(
        [sum(feature_dims[:i]) for i in range(len(feature_dims))], jnp.int32)
    return w, offsets, tables


if __name__ == "__main__":
    key = jax.random.PRNGKey(0)
    feature_dims = get_feature_dims()
    embed_dim = 128        # lane-aligned embedding width
    d_pad = 128            # packed table rows padded to a lane-aligned size
    n = 200                # not a multiple of tm=128 -> exercises N padding;
                           # grid has 2 parallel steps (both v7x TCs busy)
    num_features = len(feature_dims)

    w_packed_f32, offsets, tables = build_packed_weights(
        key, feature_dims, embed_dim, d_pad)
    w_packed = w_packed_f32.astype(jnp.bfloat16)   # bf16 operands for the MXU

    # Deterministic integer feature matrix x: (N, F), x[:, f] in [0, dim_f).
    k_idx = jax.random.fold_in(key, 1000)
    cols = []
    for f, dim in enumerate(feature_dims):
        cols.append(jax.random.randint(jax.random.fold_in(k_idx, f),
                                       (n,), 0, dim, jnp.int32))
    x = jnp.stack(cols, axis=1)                     # (N, F) int32

    idx_offset = x + offsets[None, :]               # shift into packed table

    out = mul_onehot_encoder(idx_offset, w_packed, tm=128)
    out = jax.block_until_ready(out)

    # Pure-JAX reference (same math as the PyTorch forward), using the same
    # bf16-rounded weights the kernel sees.
    ref = jnp.zeros((n, embed_dim), jnp.float32)
    for f in range(num_features):
        tbl_bf16 = tables[f].astype(jnp.bfloat16).astype(jnp.float32)
        ref = ref + tbl_bf16[x[:, f]]

    assert out.shape == (n, embed_dim)
    assert jnp.allclose(out, ref, atol=1e-5, rtol=1e-5)
    print("KERNEL_OK")
</pallas_src>

<mosaic_0001>
module attributes {stable_mosaic.version = 11 : i64} {
  func.func @_encoder_kernel(%arg0: i32, %arg1: memref<128x4xi32, #tpu.memory_space<vmem>>, %arg2: memref<128x128xbf16, #tpu.memory_space<vmem>>, %arg3: memref<128x128xf32, #tpu.memory_space<vmem>>) attributes {dimension_semantics = [#tpu.dimension_semantics<parallel>], iteration_bounds = array<i64: 2>, scalar_prefetch = 0 : i64, scratch_operands = 0 : i64, tpu.core_type = #tpu.core_type<tc>, window_params = [{transform_indices = @transform_0, window_bounds = array<i64: 128, 4>}, {pipeline_mode = #tpu.pipeline_mode<synchronous>, transform_indices = @transform_1, window_bounds = array<i64: 128, 128>}, {transform_indices = @transform_2, window_bounds = array<i64: 128, 128>}]} {
    %c0 = arith.constant 0 : index
    %c0_0 = arith.constant 0 : index
    %0 = vector.load %arg1[%c0, %c0_0] : memref<128x4xi32, #tpu.memory_space<vmem>>, vector<128x4xi32>
    %1 = tpu.iota {dimensions = array<i32: 1>} : vector<128x128xi32>
    %c0_i32 = arith.constant 0 : i32
    %2 = vector.broadcast %c0_i32 : i32 to vector<128x128xi32>
    %3 = vector.extract_strided_slice %0 {offsets = [0, 0], sizes = [128, 1], strides = [1, 1]} : vector<128x4xi32> to vector<128x1xi32>
    %4 = vector.broadcast %3 : vector<128x1xi32> to vector<128x128xi32>
    %5 = arith.cmpi eq, %1, %4 : vector<128x128xi32>
    %6 = arith.extui %5 : vector<128x128xi1> to vector<128x128xi32>
    %7 = arith.addi %2, %6 : vector<128x128xi32>
    %8 = vector.extract_strided_slice %0 {offsets = [0, 1], sizes = [128, 1], strides = [1, 1]} : vector<128x4xi32> to vector<128x1xi32>
    %9 = vector.broadcast %8 : vector<128x1xi32> to vector<128x128xi32>
    %10 = arith.cmpi eq, %1, %9 : vector<128x128xi32>
    %11 = arith.extui %10 : vector<128x128xi1> to vector<128x128xi32>
    %12 = arith.addi %7, %11 : vector<128x128xi32>
    %13 = vector.extract_strided_slice %0 {offsets = [0, 2], sizes = [128, 1], strides = [1, 1]} : vector<128x4xi32> to vector<128x1xi32>
    %14 = vector.broadcast %13 : vector<128x1xi32> to vector<128x128xi32>
    %15 = arith.cmpi eq, %1, %14 : vector<128x128xi32>
    %16 = arith.extui %15 : vector<128x128xi1> to vector<128x128xi32>
    %17 = arith.addi %12, %16 : vector<128x128xi32>
    %18 = vector.extract_strided_slice %0 {offsets = [0, 3], sizes = [128, 1], strides = [1, 1]} : vector<128x4xi32> to vector<128x1xi32>
    %19 = vector.broadcast %18 : vector<128x1xi32> to vector<128x128xi32>
    %20 = arith.cmpi eq, %1, %19 : vector<128x128xi32>
    %21 = arith.extui %20 : vector<128x128xi1> to vector<128x128xi32>
    %22 = arith.addi %17, %21 : vector<128x128xi32>
    %23 = arith.sitofp %22 : vector<128x128xi32> to vector<128x128xbf16>
    %c0_1 = arith.constant 0 : index
    %c0_2 = arith.constant 0 : index
    %24 = vector.load %arg2[%c0_1, %c0_2] : memref<128x128xbf16, #tpu.memory_space<vmem>>, vector<128x128xbf16>
    %cst = arith.constant dense<0.000000e+00> : vector<128x128xf32>
    %25 = tpu.matmul %23, %24, %cst {dimension_numbers = #tpu.dot_dimension_numbers<[1], [0], [0], [1], [0, 0, 1, 1], [], []>} : vector<128x128xbf16>, vector<128x128xbf16>, vector<128x128xf32> -> vector<128x128xf32>
    %c0_3 = arith.constant 0 : index
    %c0_4 = arith.constant 0 : index
    %26 = vector.load %arg3[%c0_3, %c0_4] : memref<128x128xf32, #tpu.memory_space<vmem>>, vector<128x128xf32>
    tpu.vector_store %arg3[%c0_3, %c0_4], %25 {strides = array<i32>} : memref<128x128xf32, #tpu.memory_space<vmem>>, vector<128x128xf32>,
    return
  }
  func.func @transform_0(%arg0: i32) -> (i32, i32) {
    %c0_i32 = arith.constant 0 : i32
    %c0_i32_0 = arith.constant 0 : i32
    return %arg0, %c0_i32 : i32, i32
  }
  func.func @transform_1(%arg0: i32) -> (i32, i32) {
    %c0_i32 = arith.constant 0 : i32
    %c0_i32_0 = arith.constant 0 : i32
    %c0_i32_1 = arith.constant 0 : i32
    return %c0_i32, %c0_i32_0 : i32, i32
  }
  func.func @transform_2(%arg0: i32) -> (i32, i32) {
    %c0_i32 = arith.constant 0 : i32
    %c0_i32_0 = arith.constant 0 : i32
    return %arg0, %c0_i32 : i32, i32
  }
}

</mosaic_0001>

<bundles_post_ra>
// kernel: tpu_custom_call.1
= control target key start
LH: loop header
LB: loop body
LE: loop exit
PB: predicated region body
PF: predicated region fallthrough
CT: control target
= control target key end

     0   :  { %7 = vsyncpa [#allocation3], 0  ;;  %s1535_s0 = inlined_call_operand.vmem [shape: s32[256,4], index: 0, kind: input, shape index: {}]   ;;  %s1536_s1 = inlined_call_operand.vmem [shape: bf16[128,128], index: 1, kind: input, shape index: {}]   ;;  %s1537_s2 = inlined_call_operand.hbm [shape: f32[256,128], index: 2, kind: output, shape index: {}]  }
   0x1   :  { %9 = vsyncpa [#allocation3 + $0x1], 0  ;;  %s1049_s9 = smov 0   ;;  %s1051_s10 = smov 0  }
   0x2   :  { %s1053_s11 = smov 0   ;;  %s1055_s12 = smov 0  }
   0x3 LB: > { %s1070_s13 = sadd.s32 4294967295, %s1025_s12   ;;  %s809_s14 = sadd.s32 4294967294, %s1025_s12   ;;  %s1025_s12 = sphi %s1055_s12, %s1543_s12   ;;  %s1021_s11 = sphi %s1053_s11, %s1542_s11   ;;  %s1017_s10 = sphi %s1051_s10, %s1541_s10   ;;  %s1013_s9 = sphi %s1049_s9, %s1540_s9  }
   0x4   : > { %s1074_s15 = sadd.s32 1, %s1025_s12   ;;  %s69_s16 = sadd.s32 1, %s1021_s11 }
   0x5   : > { %s66_s17 = ssub.s32 %s1025_s12, %s1074_s15  ;;  %p79_p0 = scmp.ne.s32.totalorder %s1021_s11, %s1017_s10 }
   0x6   : > { %p67_p1 = scmp.eq.s32.totalorder %s66_s17, 0  ;;  %p80_p2 = scmp.eq.s32.totalorder %s1070_s13, 1 }
   0x7   : > { %p85_p3 = scmp.ne.s32.totalorder %s1017_s10, %s1013_s9  ;;  %p86_p4 = scmp.eq.s32.totalorder %s809_s14, 1 }
   0x8   : > { %s1085_s18 = scalar_select %p67_p1, %s1021_s11, %s69_s16  }
   0x9   : > { %p1087_p5 = por %p80_p2, %p79_p0  ;;  %p1091_p6 = por %p86_p4, %p85_p3 }
   0xa   : > { %p812_p7 = scmp.ge.s32.totalorder %s1025_s12, 1  ;;  %p116_p8 = scmp.lt.s32.totalorder %s1025_s12, 3 }
   0xc   : > { %p117_p9 = pnand %p812_p7, %p116_p8 }
   0xd   : > { %s814_s21 = sshll.u32 (!%p117_p9), %s1070_s13, 4  ;;  %v1027_v0 = vmov (!%p117_p9), 0   ;;  %v1028_v6 = vmov (!%p117_p9), 1   ;;  %v1029_v14 = vmov (!%p117_p9), 2   ;;  %v1030_v17 = vmov (!%p117_p9), 3   ;;  %v955_v18 = vld [vmem:[%s1536_s1] sm:$0xff] (!%p117_p9)  }
   0xe   : > { %120 = sbr.rel (%p117_p9) target bundleno = 546 (0x222), region = 28  ;;  %940 = vset.pattern.permute.xlu1 (!%p117_p9), %v1027_v0  ;;  %939 = vset.pattern.permute.xlu0 (!%p117_p9), %v1027_v0  ;;  %p139_p10 = scmp.lt.s32.totalorder (!%p117_p9), %s814_s21, 31  ;;  %v956_v19 = vld [vmem:[%s1536_s1 + $0x8] sm:$0xff] (!%p117_p9)   ;;  %v957_v20 = vld [vmem:[%s1536_s1 + $0x10] sm:$0xff] (!%p117_p9)   ;;  %v958_v22 = vld [vmem:[%s1536_s1 + $0x18] sm:$0xff] (!%p117_p9)   ;;  %v162_v57 = vlaneseq (!%p117_p9) }
   0xf   : > { %846 = vmatprep.subr.bf16.mxu0 (!%p117_p9), %v955_v18  ;;  %878 = vmatprep.subr.bf16.mxu1 (!%p117_p9), %v955_v18  ;;  %v959_v23 = vld [vmem:[%s1536_s1 + $0x20] sm:$0xff] (!%p117_p9)   ;;  %v960_v25 = vld [vmem:[%s1536_s1 + $0x28] sm:$0xff] (!%p117_p9)   ;;  %v961_v26 = vld [vmem:[%s1536_s1 + $0x30] sm:$0xff] (!%p117_p9)   ;;  %s135_s23 = sand.u32 (!%p117_p9), 1, %s1017_s10   ;;  %s829_s26 = sshll.u32 (!%p117_p9), %s1070_s13, 11 }
  0x10   : > { %847 = vmatpush3.bf16.msra.mxu0 (!%p117_p9), %v955_v18  ;;  %886 = vmatpush3.bf16.msra.mxu1 (!%p117_p9), %v955_v18  ;;  %v962_v27 = vld [vmem:[%s1536_s1 + $0x38] sm:$0xff] (!%p117_p9)   ;;  %v1259_v60 = vand.u32 (!%p117_p9), 127, %v162_v57  ;;  %s813_s24 = sshll.u32 (!%p117_p9), %s135_s23, 7  ;;  %s1485_s30 = scalar_lea.hbm (!%p117_p9), %s1537_s2, %s829_s26 }
  0x11   : > { %848 = vmatprep.subr.bf16.mxu0 (!%p117_p9), %v956_v19  ;;  %879 = vmatprep.subr.bf16.mxu1 (!%p117_p9), %v956_v19  ;;  %s1494_s13 = scalar_lea.sflag (!%p117_p9), [#allocation3], %s135_s23  ;;  %s1031_s4 = smov (!%p117_p9), [#allocation2]  }
  0x12   : > { %s967_s5 = sshll.u32 (!%p117_p9), %s1031_s4, 4  ;;  %s968_s5 = int_to_ptr.vmem [resolvable:$false] %s967_s5 }
  0x13   : > { %s969_s6 = scalar_lea.vmem (!%p117_p9), %s968_s5, 4096 }
  0x14   : > { %849 = vmatpush3.bf16.msra.mxu0 (!%p117_p9), %v956_v19  ;;  %887 = vmatpush3.bf16.msra.mxu1 (!%p117_p9), %v956_v19 }
  0x15   : > { %s1545_s21 = smov (!%p139_p10, %s814_s21), 31  ;;  %850 = vmatprep.subr.bf16.mxu0 %v957_v20  ;;  %880 = vmatprep.subr.bf16.mxu1 %v957_v20 }
  0x16   : > { %s815_s22 = sshll.u32 %s1545_s21, 3 }
  0x17   : > { %s1103_s25 = scalar_lea.vmem %s1535_s0, %s815_s22 }
  0x18   : > { %v154_v1 = vld [vmem:[%s1103_s25 + $0x40] sm:$0xff]  ;;  %v1111_v3 = vld [vmem:[%s1103_s25 + $0x48] sm:$0xff]  ;;  %v1116_v5 = vld [vmem:[%s1103_s25 + $0x18] sm:$0xff]  ;;  %851 = vmatpush3.bf16.msra.mxu0 %v957_v20  ;;  %888 = vmatpush3.bf16.msra.mxu1 %v957_v20 }
  0x19   : > { %v1107_v2 = vld [vmem:[%s1103_s25] sm:$0xff]  ;;  %189 = vperm.xlu1 %940, %v154_v1   ;;  %v147_v4 = vld [vmem:[%s1103_s25 + $0x8] sm:$0xff]  ;;  %v1125_v8 = vld [vmem:[%s1103_s25 + $0x38] sm:$0xff]  ;;  %852 = vmatprep.subr.bf16.mxu0 %v958_v22 }
  0x1a   : > { %165 = vperm.xlu0 %939, %v1107_v2   ;;  %v1121_v7 = vld [vmem:[%s1103_s25 + $0x28] sm:$0xff]  ;;  %v148_v9 = vld [vmem:[%s1103_s25 + $0x10] sm:$0xff]  ;;  %v1134_v11 = vld [vmem:[%s1103_s25 + $0x58] sm:$0xff]  ;;  %881 = vmatprep.subr.bf16.mxu1 %v958_v22 }
  0x1b   : > { %v156_v10 = vld [vmem:[%s1103_s25 + $0x50] sm:$0xff]  ;;  %v1142_v12 = vld [vmem:[%s1103_s25 + $0x20] sm:$0xff]  ;;  %v1146_v13 = vld [vmem:[%s1103_s25 + $0x68] sm:$0xff] }
  0x1c   : > { %v1152_v15 = vld [vmem:[%s1103_s25 + $0x30] sm:$0xff]  ;;  %v1156_v16 = vld [vmem:[%s1103_s25 + $0x78] sm:$0xff]  ;;  %853 = vmatpush3.bf16.msra.mxu0 %v958_v22  ;;  %889 = vmatpush3.bf16.msra.mxu1 %v958_v22  ;;  %v158_v24 = vld [vmem:[%s1103_s25 + $0x60] sm:$0xff] }
  0x1d   : > { %192 = vperm.xlu1 %940, %v1111_v3   ;;  %v1176_v21 = vld [vmem:[%s1103_s25 + $0x70] sm:$0xff]  ;;  %854 = vmatprep.subr.bf16.mxu0 %v959_v23  ;;  %s1465_s25 = scalar_lea.vmem [#allocation2], %s813_s24 }
  0x1e   : > { %168 = vperm.xlu0 %939, %v147_v4   ;;  %882 = vmatprep.subr.bf16.mxu1 %v959_v23  ;;  %s747_s27 = sshll.u32 %s1465_s25, 4  ;;  %s1487_s27 = int_to_ptr.vmem [resolvable:$true] %s747_s27 }
  0x1f   : > { %s963_s3 = scalar_lea.vmem %s1487_s27, 2048  ;;  %p970_p0 = scmp.lt.s32.totalorder %s1487_s27, %s968_s5 }
  0x20   : > { %855 = vmatpush3.bf16.msra.mxu0 %v959_v23  ;;  %890 = vmatpush3.bf16.msra.mxu1 %v959_v23  ;;  %p964_p11 = scmp.ne.s32.totalorder %s1487_s27, %s963_s3  ;;  %p971_p1 = scmp.lt.s32.totalorder %s969_s6, %s963_s3 }
  0x21   : > { %941 = vset.pattern.permute.xlu1 %v1028_v6  ;;  %856 = vmatprep.subr.bf16.mxu0 %v960_v25 }
  0x22   : > { %174 = vperm.xlu0 %939, %v1116_v5   ;;  %248 = vperm.xlu1 %941, %v147_v4   ;;  %p965_p12 = pnand %p964_p11, %p1087_p5  ;;  %p972_p2 = por %p971_p1, %p970_p0 }
  0x23   : > { %883 = vmatprep.subr.bf16.mxu1 %v960_v25 }
  0x24   : > { %857 = vmatpush3.bf16.msra.mxu0 %v960_v25  ;;  %891 = vmatpush3.bf16.msra.mxu1 %v960_v25  ;;  %p966_p13 = pneg %p965_p12 }
  0x25   : > { %858 = vmatprep.subr.bf16.mxu0 %v961_v26  ;;  %884 = vmatprep.subr.bf16.mxu1 %v961_v26 }
  0x26   : > { %180 = vperm.xlu0 %939, %v1121_v7   ;;  %269 = vperm.xlu1 %941, %v154_v1   ;;  %p973_p3 = pnand %p972_p2, %p966_p13 }
  0x28   : > { %859 = vmatpush3.bf16.msra.mxu0 %v961_v26  ;;  %892 = vmatpush3.bf16.msra.mxu1 %v961_v26 }
  0x29   : > { %860 = vmatprep.subr.bf16.mxu0 %v962_v27  ;;  %885 = vmatprep.subr.bf16.mxu1 %v962_v27 }
  0x2a   : > { %186 = vperm.xlu0 %939, %v1125_v8   ;;  %942 = vset.pattern.permute.xlu1 %v1027_v0 }
  0x2b   : > { %171 = vperm.xlu1 %942, %v148_v9  }
  0x2c   : > { %861 = vmatpush3.bf16.msra.mxu0 %v962_v27  ;;  %893 = vmatpush3.bf16.msra.mxu1 %v962_v27 }
  0x2e   : > { %949 = vset.pattern.permute.xlu0 %v1028_v6 }
  0x2f   : > { %245 = vperm.xlu0 %949, %v1107_v2   ;;  %195 = vperm.xlu1 %942, %v156_v10  }
  0x33   : > { %272 = vperm.xlu0 %949, %v1111_v3   ;;  %198 = vperm.xlu1 %942, %v1134_v11  }
  0x37   : > { %251 = vperm.xlu0 %949, %v148_v9   ;;  %943 = vset.pattern.permute.xlu1 %v1028_v6 }
  0x38   : > { %254 = vperm.xlu1 %943, %v1116_v5  }
  0x3b   : > { %278 = vperm.xlu0 %949, %v1134_v11  }
  0x3c   : > { %275 = vperm.xlu1 %943, %v156_v10  }
  0x3f   : > { %257 = vperm.xlu0 %949, %v1142_v12  }
  0x40   : > { %944 = vset.pattern.permute.xlu1 %v1029_v14 }
  0x41   : > { %341 = vperm.xlu1 %944, %v1107_v2  }
  0x43   : > { %284 = vperm.xlu0 %949, %v1146_v13  }
  0x45   : > { %365 = vperm.xlu1 %944, %v154_v1  }
  0x47   : > { %263 = vperm.xlu0 %949, %v1152_v15  }
  0x49   : > { %368 = vperm.xlu1 %944, %v1111_v3  }
  0x4b   : > { %290 = vperm.xlu0 %949, %v1156_v16  }
  0x4d   : > { %350 = vperm.xlu1 %944, %v1116_v5  }
  0x4f   : > { %951 = vset.pattern.permute.xlu0 %v1029_v14 }
  0x50   : > { %344 = vperm.xlu0 %951, %v147_v4  }
  0x51   : > { %374 = vperm.xlu1 %944, %v1134_v11  }
  0x54   : > { %347 = vperm.xlu0 %951, %v148_v9  }
  0x55   : > { %945 = vset.pattern.permute.xlu1 %v1030_v17 }
  0x56   : > { %440 = vperm.xlu1 %945, %v147_v4  }
  0x58   : > { %371 = vperm.xlu0 %951, %v156_v10  }
  0x5a   : > { %461 = vperm.xlu1 %945, %v154_v1  }
  0x5c   : > { %356 = vperm.xlu0 %951, %v1121_v7  }
  0x5e   : > { %443 = vperm.xlu1 %945, %v148_v9  }
  0x60   : > { %359 = vperm.xlu0 %951, %v1152_v15  }
  0x62   : > { %467 = vperm.xlu1 %945, %v156_v10  }
  0x64   : > { %383 = vperm.xlu0 %951, %v1176_v21  }
  0x66   : > { %946 = vset.pattern.permute.xlu1 %v1027_v0 }
  0x67   : > { %177 = vperm.xlu1 %946, %v1142_v12  }
  0x68   : > { %953 = vset.pattern.permute.xlu0 %v1030_v17 }
  0x69   : > { %437 = vperm.xlu0 %953, %v1107_v2  }
  0x6b   : > { %201 = vperm.xlu1 %946, %v158_v24  }
  0x6d   : > { %464 = vperm.xlu0 %953, %v1111_v3  }
  0x6f   : > { %204 = vperm.xlu1 %946, %v1146_v13  }
  0x71   : > { %446 = vperm.xlu0 %953, %v1116_v5  }
  0x73   : > { %947 = vset.pattern.permute.xlu1 %v1028_v6 }
  0x74   : > { %260 = vperm.xlu1 %947, %v1121_v7  }
  0x75   : > { %470 = vperm.xlu0 %953, %v1134_v11  }
  0x78   : > { %281 = vperm.xlu1 %947, %v158_v24  }
  0x79   : > { %449 = vperm.xlu0 %953, %v1142_v12  }
  0x7c   : > { %948 = vset.pattern.permute.xlu1 %v1027_v0 }
  0x7d   : > { %476 = vperm.xlu0 %953, %v1146_v13   ;;  %183 = vperm.xlu1 %948, %v1152_v15  }
  0x81   : > { %458 = vperm.xlu0 %953, %v1125_v8   ;;  %207 = vperm.xlu1 %948, %v1176_v21  }
  0x85   : > { %482 = vperm.xlu0 %953, %v1156_v16   ;;  %210 = vperm.xlu1 %948, %v1156_v16  }
  0x89   : > { %950 = vset.pattern.permute.xlu1 %v1028_v6 }
  0x8a   : > { %266 = vperm.xlu1 %950, %v1125_v8  }
  0x8e   : > { %287 = vperm.xlu1 %950, %v1176_v21  }
  0x92   : > { %952 = vset.pattern.permute.xlu1 %v1029_v14 }
  0x93   : > { %353 = vperm.xlu1 %952, %v1142_v12  }
  0x97   : > { %377 = vperm.xlu1 %952, %v158_v24  }
  0x98   : > { %v190_v28 = vpop.permute.xlu1 %189 }
  0x99   : > { %v166_v29 = vpop.permute.xlu0 %165  ;;  %vm220_vm0 = vcmp.eq.s32.totalorder %v1259_v60, %v190_v28 }
  0x9a   : > { %vm212_vm3 = vcmp.eq.s32.totalorder %v1259_v60, %v166_v29  ;;  %v236_v1 = vsel %vm220_vm0, 1, %v1027_v0 }
  0x9b   : > { %380 = vperm.xlu1 %952, %v1146_v13   ;;  %v228_v5 = vsel %vm212_vm3, 1, %v1027_v0 }
  0x9c   : > { %v193_v30 = vpop.permute.xlu1 %192 }
  0x9d   : > { %v169_v31 = vpop.permute.xlu0 %168  ;;  %vm221_vm5 = vcmp.eq.s32.totalorder %v1259_v60, %v193_v30 }
  0x9e   : > { %vm213_vm1 = vcmp.eq.s32.totalorder %v1259_v60, %v169_v31 }
  0x9f   : > { %362 = vperm.xlu1 %952, %v1125_v8   ;;  %v229_v2 = vsel %vm213_vm1, 1, %v1027_v0 }
  0xa1   : > { %v175_v32 = vpop.permute.xlu0 %174  ;;  %v249_v33 = vpop.permute.xlu1 %248 }
  0xa2   : > { %vm293_vm2 = vcmp.eq.s32.totalorder %v1259_v60, %v249_v33  ;;  %vm215_vm6 = vcmp.eq.s32.totalorder %v1259_v60, %v175_v32 }
  0xa3   : > { %386 = vperm.xlu1 %952, %v1156_v16   ;;  %v309_v3 = vsel %vm293_vm2, 1, %v1027_v0  ;;  %v231_v8 = vsel %vm215_vm6, 1, %v1027_v0 }
  0xa4   : > { %v325_v9 = vadd.s32 %v309_v3, %v229_v2 }
  0xa5   : > { %v1221_v34 = vpop.permute.xlu0 %180  ;;  %v270_v35 = vpop.permute.xlu1 %269 }
  0xa6   : > { %vm300_vm4 = vcmp.eq.s32.totalorder %v1259_v60, %v270_v35 }
  0xa7   : > { %954 = vset.pattern.permute.xlu1 %v1030_v17  ;;  %v316_v6 = vsel %vm300_vm4, 1, %v1027_v0 }
  0xa8   : > { %452 = vperm.xlu1 %954, %v1121_v7   ;;  %v237_v7 = vsel %vm221_vm5, 1, %v1027_v0  ;;  %v332_v12 = vadd.s32 %v316_v6, %v236_v1 }
  0xa9   : > { %v1225_v36 = vpop.permute.xlu0 %186 }
  0xaa   : > { %v172_v37 = vpop.permute.xlu1 %171 }
  0xab   : > { %vm214_vm10 = vcmp.eq.s32.totalorder %v1259_v60, %v172_v37 }
  0xac   : > { %473 = vperm.xlu1 %954, %v158_v24   ;;  %v230_v16 = vsel %vm214_vm10, 1, %v1027_v0 }
  0xae   : > { %v246_v38 = vpop.permute.xlu0 %245  ;;  %v1227_v39 = vpop.permute.xlu1 %195 }
  0xaf   : > { %vm292_vm7 = vcmp.eq.s32.totalorder %v1259_v60, %v246_v38  ;;  %vm222_vm12 = vcmp.eq.s32.totalorder %v1259_v60, %v1227_v39 }
  0xb0   : > { %455 = vperm.xlu1 %954, %v1152_v15   ;;  %v308_v10 = vsel %vm292_vm7, 1, %v1027_v0  ;;  %v238_v19 = vsel %vm222_vm12, 1, %v1027_v0 }
  0xb1   : > { %v324_v18 = vadd.s32 %v308_v10, %v228_v5 }
  0xb2   : > { %v273_v40 = vpop.permute.xlu0 %272  ;;  %v1230_v41 = vpop.permute.xlu1 %198 }
  0xb3   : > { %vm301_vm8 = vcmp.eq.s32.totalorder %v1259_v60, %v273_v40  ;;  %vm223_vm15 = vcmp.eq.s32.totalorder %v1259_v60, %v1230_v41 }
  0xb4   : > { %479 = vperm.xlu1 %954, %v1176_v21   ;;  %v317_v13 = vsel %vm301_vm8, 1, %v1027_v0  ;;  %v239_v24 = vsel %vm223_vm15, 1, %v1027_v0  ;;  %vm217_vm15 = vcmp.eq.s32.totalorder %v1259_v60, %v1221_v34 }
  0xb5   : > { %v333_v21 = vadd.s32 %v317_v13, %v237_v7 }
  0xb6   : > { %v252_v42 = vpop.permute.xlu0 %251 }
  0xb7   : > { %v1233_v43 = vpop.permute.xlu1 %254  ;;  %vm294_vm11 = vcmp.eq.s32.totalorder %v1259_v60, %v252_v42 }
  0xb8   : > { %v310_v17 = vsel %vm294_vm11, 1, %v1027_v0  ;;  %vm295_vm0 = vcmp.eq.s32.totalorder %v1259_v60, %v1233_v43 }
  0xb9   : > { %v326_v25 = vadd.s32 %v310_v17, %v230_v16  ;;  %v311_v26 = vsel %vm295_vm0, 1, %v1027_v0 }
  0xba   : > { %v1235_v44 = vpop.permute.xlu0 %278 }
  0xbb   : > { %v1237_v45 = vpop.permute.xlu1 %275  ;;  %vm303_vm8 = vcmp.eq.s32.totalorder %v1259_v60, %v1235_v44 }
  0xbc   : > { %vm302_vm4 = vcmp.eq.s32.totalorder %v1259_v60, %v1237_v45 }
  0xbd   : > { %v318_v37 = vsel %vm302_vm4, 1, %v1027_v0 }
  0xbe   : > { %v1239_v46 = vpop.permute.xlu0 %257  ;;  %v334_v2 = vadd.s32 %v318_v37, %v238_v19 }
  0xc0   : > { %v342_v47 = vpop.permute.xlu1 %341 }
  0xc1   : > { %vm388_vm14 = vcmp.eq.s32.totalorder %v1259_v60, %v342_v47 }
  0xc2   : > { %v1241_v48 = vpop.permute.xlu0 %284  ;;  %v404_v22 = vsel %vm388_vm14, 1, %v1027_v0 }
  0xc3   : > { %v420_v31 = vadd.s32 %v404_v22, %v324_v18 }
  0xc4   : > { %v1243_v49 = vpop.permute.xlu1 %365 }
  0xc5   : > { %vm396_vm1 = vcmp.eq.s32.totalorder %v1259_v60, %v1243_v49 }
  0xc6   : > { %v1245_v50 = vpop.permute.xlu0 %263  ;;  %v412_v28 = vsel %vm396_vm1, 1, %v1027_v0 }
  0xc7   : > { %v428_v38 = vadd.s32 %v412_v28, %v332_v12 }
  0xc8   : > { %v1247_v51 = vpop.permute.xlu1 %368 }
  0xc9   : > { %vm397_vm2 = vcmp.eq.s32.totalorder %v1259_v60, %v1247_v51 }
  0xca   : > { %v1249_v52 = vpop.permute.xlu0 %290  ;;  %v413_v32 = vsel %vm397_vm2, 1, %v1027_v0 }
  0xcb   : > { %v429_v42 = vadd.s32 %v413_v32, %v333_v21 }
  0xcc   : > { %v1251_v53 = vpop.permute.xlu1 %350 }
  0xcd   : > { %vm391_vm6 = vcmp.eq.s32.totalorder %v1259_v60, %v1251_v53 }
  0xce   : > { %v407_v43 = vsel %vm391_vm6, 1, %v1027_v0 }
  0xcf   : > { %v345_v54 = vpop.permute.xlu0 %344 }
  0xd0   : > { %v1253_v55 = vpop.permute.xlu1 %374  ;;  %vm389_vm9 = vcmp.eq.s32.totalorder %v1259_v60, %v345_v54  ;;  %v327_v54 = vadd.s32 %v311_v26, %v231_v8 }
  0xd1   : > { %v405_v14 = vsel %vm389_vm9, 1, %v1027_v0  ;;  %vm399_vm12 = vcmp.eq.s32.totalorder %v1259_v60, %v1253_v55 }
  0xd2   : > { %v421_v23 = vadd.s32 %v405_v14, %v325_v9  ;;  %v423_v3 = vadd.s32 %v407_v43, %v327_v54  ;;  %v415_v7 = vsel %vm399_vm12, 1, %v1027_v0 }
  0xd3   : > { %v1255_v56 = vpop.permute.xlu0 %347 }
  0xd4   : > { %vm390_vm5 = vcmp.eq.s32.totalorder %v1259_v60, %v1255_v56 }
  0xd5   : > { %v441_v58 = vpop.permute.xlu1 %440  ;;  %v406_v39 = vsel %vm390_vm5, 1, %v1027_v0 }
  0xd6   : > { %vm485_vm13 = vcmp.eq.s32.totalorder %v1259_v60, %v441_v58  ;;  %v422_v56 = vadd.s32 %v406_v39, %v326_v25  ;;  %v319_v58 = vsel %vm303_vm8, 1, %v1027_v0 }
  0xd7   : > { %v1257_v59 = vpop.permute.xlu0 %371  ;;  %v501_v20 = vsel %vm485_vm13, 1, %v1027_v0  ;;  %v335_v9 = vadd.s32 %v319_v58, %v239_v24 }
  0xd8   : > { %v517_v30 = vadd.s32 %v501_v20, %v421_v23  ;;  %vm398_vm10 = vcmp.eq.s32.totalorder %v1259_v60, %v1257_v59 }
  0xd9   : > { %v462_v61 = vpop.permute.xlu1 %461  ;;  %v414_v55 = vsel %vm398_vm10, 1, %v1027_v0  ;;  %v431_v16 = vadd.s32 %v415_v7, %v335_v9  ;;  %vm305_vm10 = vcmp.eq.s32.totalorder %v1259_v60, %v1241_v48 }
  0xda   : > { %vm492_vm3 = vcmp.eq.s32.totalorder %v1259_v60, %v462_v61  ;;  %v533_v47 = vcvt.s32.f32 %v517_v30  ;;  %v430_v12 = vadd.s32 %v414_v55, %v334_v2 }
  0xdb   : > { %v1261_v62 = vpop.permute.xlu0 %356  ;;  %v508_v33 = vsel %vm492_vm3, 1, %v1027_v0  ;;  %vm298_vm3 = vcmp.eq.s32.totalorder %v1259_v60, %v1245_v50 }
  0xdc   : > { %v524_v53 = vadd.s32 %v508_v33, %v428_v38  ;;  %vm393_vm0 = vcmp.eq.s32.totalorder %v1259_v60, %v1261_v62  ;;  %v314_v33 = vsel %vm298_vm3, 1, %v1027_v0 }
  0xdd   : > { %v1270_v63 = vpop.permute.xlu1 %443  ;;  %v409_v62 = vsel %vm393_vm0, 1, %v1027_v0 }
  0xde   : > { %vm486_vm9 = vcmp.eq.s32.totalorder %v1259_v60, %v1270_v63  ;;  %v540_v44 = vcvt.s32.f32 %v524_v53 }
  0xdf   : > { %v1276_v4 = vpop.permute.xlu0 %359  ;;  %v502_v49 = vsel %vm486_vm9, 1, %v1027_v0 }
  0xe0   : > { %v518_v5 = vadd.s32 %v502_v49, %v422_v56  ;;  %vm394_vm4 = vcmp.eq.s32.totalorder %v1259_v60, %v1276_v4 }
  0xe1   : > { %v1290_v11 = vpop.permute.xlu1 %467 }
  0xe2   : > { %vm494_vm13 = vcmp.eq.s32.totalorder %v1259_v60, %v1290_v11  ;;  %v534_v17 = vcvt.s32.f32 %v518_v5  ;;  %v233_v11 = vsel %vm217_vm15, 1, %v1027_v0 }
  0xe3   : > { %v1295_v15 = vpop.permute.xlu0 %383  ;;  %v510_v10 = vsel %vm494_vm13, 1, %v1027_v0 }
  0xe4   : > { %v526_v20 = vadd.s32 %v510_v10, %v430_v12 }
  0xe6   : > { %v1313_v27 = vpop.permute.xlu1 %177 }
  0xe7   : > { %vm216_vm6 = vcmp.eq.s32.totalorder %v1259_v60, %v1313_v27 }
  0xe8   : > { %v438_v29 = vpop.permute.xlu0 %437 }
  0xe9   : > { %vm484_vm7 = vcmp.eq.s32.totalorder %v1259_v60, %v438_v29  ;;  %v542_v29 = vcvt.s32.f32 %v526_v20 }
  0xea   : > { %v500_v35 = vsel %vm484_vm7, 1, %v1027_v0  ;;  %v1332_v40 = vpop.permute.xlu1 %201  ;;  %vm296_vm7 = vcmp.eq.s32.totalorder %v1259_v60, %v1239_v46 }
  0xeb   : > { %v516_v41 = vadd.s32 %v500_v35, %v420_v31  ;;  %v410_v35 = vsel %vm394_vm4, 1, %v1027_v0  ;;  %v312_v54 = vsel %vm296_vm7, 1, %v1027_v0  ;;  %vm224_vm15 = vcmp.eq.s32.totalorder %v1259_v60, %v1332_v40 }
  0xec   : > { %v465_v45 = vpop.permute.xlu0 %464  ;;  %v240_v55 = vsel %vm224_vm15, 1, %v1027_v0 }
  0xed   : > { %vm493_vm11 = vcmp.eq.s32.totalorder %v1259_v60, %v465_v45  ;;  %v532_v51 = vcvt.s32.f32 %v516_v41 }
  0xee   : > { %v509_v57 = vsel %vm493_vm11, 1, %v1027_v0  ;;  %v1348_v61 = vpop.permute.xlu1 %204 }
  0xef   : > { %v548_v63 = vpack.c.bf16 %v533_v47, %v532_v51  ;;  %v525_v1 = vadd.s32 %v509_v57, %v429_v42  ;;  %v232_v51 = vsel %vm216_vm6, 1, %v1027_v0  ;;  %vm225_vm9 = vcmp.eq.s32.totalorder %v1259_v60, %v1348_v61 }
  0xf0   : > { %v447_v6 = vpop.permute.xlu0 %446  ;;  %v328_v27 = vadd.s32 %v312_v54, %v232_v51  ;;  %v241_v46 = vsel %vm225_vm9, 1, %v1027_v0  ;;  %v321_v61 = vsel %vm305_vm10, 1, %v1027_v0 }
  0xf1   : > { %vm487_vm14 = vcmp.eq.s32.totalorder %v1259_v60, %v447_v6  ;;  %862 = vmatprep.mubr.bf16.mxu0 %v548_v63  ;;  %v541_v8 = vcvt.s32.f32 %v525_v1 }
  0xf2   : > { %v503_v59 = vsel %vm487_vm14, 1, %v1027_v0  ;;  %vm219_vm14 = vcmp.eq.s32.totalorder %v1259_v60, %v1225_v36  ;;  %v337_v36 = vadd.s32 %v321_v61, %v241_v46 }
  0xf3   : > { %v519_v13 = vadd.s32 %v503_v59, %v423_v3  ;;  %v552_v14 = vpack.c.bf16 %v541_v8, %v540_v44  ;;  %v261_v18 = vpop.permute.xlu1 %260  ;;  %v235_v3 = vsel %vm219_vm14, 1, %v1027_v0 }
  0xf4   : > { %v471_v19 = vpop.permute.xlu0 %470  ;;  %vm297_vm1 = vcmp.eq.s32.totalorder %v1259_v60, %v261_v18 }
  0xf5   : > { %v535_v21 = vcvt.s32.f32 %v519_v13  ;;  %vm495_vm2 = vcmp.eq.s32.totalorder %v1259_v60, %v471_v19  ;;  %870 = vmatprep.mubr.bf16.mxu1 %v552_v14  ;;  %v313_v22 = vsel %vm297_vm1, 1, %v1027_v0 }
  0xf6   : > { %v511_v23 = vsel %vm495_vm2, 1, %v1027_v0  ;;  %v329_v24 = vadd.s32 %v313_v22, %v233_v11  ;;  %vm307_vm2 = vcmp.eq.s32.totalorder %v1259_v60, %v1249_v52 }
  0xf7   : > { %v527_v25 = vadd.s32 %v511_v23, %v431_v16  ;;  %v549_v26 = vpack.c.bf16 %v535_v21, %v534_v17  ;;  %v282_v28 = vpop.permute.xlu1 %281  ;;  %v323_v23 = vsel %vm307_vm2, 1, %v1027_v0 }
  0xf8   : > { %v1374_v31 = vadd.s32 %v409_v62, %v329_v24  ;;  %v450_v47 = vpop.permute.xlu0 %449  ;;  %vm304_vm11 = vcmp.eq.s32.totalorder %v1259_v60, %v282_v28 }
  0xf9   : > { %v543_v30 = vcvt.s32.f32 %v527_v25  ;;  %863 = vmatmul.mubr.bf16.vlgmr.msra.gmra.mrb[0].mxu0 %v549_v26  ;;  %vm488_vm12 = vcmp.eq.s32.totalorder %v1259_v60, %v450_v47  ;;  %v320_v63 = vsel %vm304_vm11, 1, %v1027_v0 }
  0xfa   : > { %v504_v1 = vsel %vm488_vm12, 1, %v1027_v0  ;;  %v336_v5 = vadd.s32 %v320_v63, %v240_v55  ;;  %vm402_vm12 = vcmp.eq.s32.totalorder %v1259_v60, %v1295_v15 }
  0xfb   : > { %v553_v32 = vpack.c.bf16 %v543_v30, %v542_v29 }
  0xfc   : > { %v184_v34 = vpop.permute.xlu1 %183  ;;  %v477_v56 = vpop.permute.xlu0 %476 }
  0xfd   : > { %871 = vmatmul.mubr.bf16.vlgmr.msra.gmra.mrb[0].mxu1 %v553_v32  ;;  %vm218_vm5 = vcmp.eq.s32.totalorder %v1259_v60, %v184_v34  ;;  %vm497_vm1 = vcmp.eq.s32.totalorder %v1259_v60, %v477_v56 }
  0xfe   : > { %v234_v37 = vsel %vm218_vm5, 1, %v1027_v0  ;;  %v513_v9 = vsel %vm497_vm1, 1, %v1027_v0 }
  0xff   : > { %v330_v38 = vadd.s32 %v314_v33, %v234_v37 }
 0x100   : > { %v1384_v39 = vpop.permute.xlu1 %207  ;;  %v459_v40 = vpop.permute.xlu0 %458 }
 0x101   : > { %v1386_v41 = vadd.s32 %v410_v35, %v330_v38  ;;  %vm226_vm9 = vcmp.eq.s32.totalorder %v1259_v60, %v1384_v39  ;;  %v418_v39 = vsel %vm402_vm12, 1, %v1027_v0 }
 0x102   : > { %v242_v26 = vsel %vm226_vm9, 1, %v1027_v0 }
 0x104   : > { %v211_v42 = vpop.permute.xlu1 %210  ;;  %v483_v11 = vpop.permute.xlu0 %482 }
 0x105   : > { %vm227_vm5 = vcmp.eq.s32.totalorder %v1259_v60, %v211_v42 }
 0x106   : > { %v243_v16 = vsel %vm227_vm5, 1, %v1027_v0 }
 0x107   : > { %v339_v28 = vadd.s32 %v323_v23, %v243_v16 }
 0x109   : > { %v267_v50 = vpop.permute.xlu1 %266 }
 0x10a   : > { %vm299_vm0 = vcmp.eq.s32.totalorder %v1259_v60, %v267_v50 }
 0x10b   : > { %v315_v6 = vsel %vm299_vm0, 1, %v1027_v0 }
 0x10c   : > { %v331_v13 = vadd.s32 %v315_v6, %v235_v3 }
 0x10d   : > { %v288_v43 = vpop.permute.xlu1 %287 }
 0x10e   : > { %vm306_vm6 = vcmp.eq.s32.totalorder %v1259_v60, %v288_v43 }
 0x10f   : > { %v322_v17 = vsel %vm306_vm6, 1, %v1027_v0 }
 0x112   : > { %v354_v45 = vpop.permute.xlu1 %353 }
 0x113   : > { %vm392_vm8 = vcmp.eq.s32.totalorder %v1259_v60, %v354_v45 }
 0x114   : > { %v408_v57 = vsel %vm392_vm8, 1, %v1027_v0  ;;  %vm491_vm8 = vcmp.eq.s32.totalorder %v1259_v60, %v459_v40 }
 0x115   : > { %v424_v48 = vadd.s32 %v408_v57, %v328_v27  ;;  %v507_v52 = vsel %vm491_vm8, 1, %v1027_v0 }
 0x116   : > { %v378_v4 = vpop.permute.xlu1 %377 }
 0x117   : > { %vm400_vm3 = vcmp.eq.s32.totalorder %v1259_v60, %v378_v4  ;;  %v520_v7 = vadd.s32 %v504_v1, %v424_v48 }
 0x118   : > { %v416_v10 = vsel %vm400_vm3, 1, %v1027_v0 }
 0x119   : > { %v536_v18 = vcvt.s32.f32 %v520_v7  ;;  %v432_v21 = vadd.s32 %v416_v10, %v336_v5 }
 0x11a   : > { %v381_v49 = vpop.permute.xlu1 %380 }
 0x11b   : > { %vm401_vm13 = vcmp.eq.s32.totalorder %v1259_v60, %v381_v49 }
 0x11c   : > { %v417_v2 = vsel %vm401_vm13, 1, %v1027_v0  ;;  %vm499_vm13 = vcmp.eq.s32.totalorder %v1259_v60, %v483_v11 }
 0x11d   : > { %v433_v44 = vadd.s32 %v417_v2, %v337_v36  ;;  %v515_v43 = vsel %vm499_vm13, 1, %v1027_v0 }
 0x11e   : > { %v363_v53 = vpop.permute.xlu1 %362 }
 0x11f   : > { %vm395_vm4 = vcmp.eq.s32.totalorder %v1259_v60, %v363_v53  ;;  %v529_v19 = vadd.s32 %v513_v9, %v433_v44 }
 0x120   : > { %v411_v59 = vsel %vm395_vm4, 1, %v1027_v0 }
 0x121   : > { %v427_v62 = vadd.s32 %v411_v59, %v331_v13  ;;  %v545_v32 = vcvt.s32.f32 %v529_v19 }
 0x122   : > { %v387_v58 = vpop.permute.xlu1 %386 }
 0x123   : > { %vm403_vm10 = vcmp.eq.s32.totalorder %v1259_v60, %v387_v58  ;;  %v523_v33 = vadd.s32 %v507_v52, %v427_v62 }
 0x124   : > { %v419_v24 = vsel %vm403_vm10, 1, %v1027_v0 }
 0x125   : > { %v435_v35 = vadd.s32 %v419_v24, %v339_v28  ;;  %v539_v47 = vcvt.s32.f32 %v523_v33 }
 0x127   : > { %v453_v8 = vpop.permute.xlu1 %452  ;;  %v531_v49 = vadd.s32 %v515_v43, %v435_v35 }
 0x128   : > { %vm489_vm7 = vcmp.eq.s32.totalorder %v1259_v60, %v453_v8 }
 0x129   : > { %v505_v12 = vsel %vm489_vm7, 1, %v1027_v0  ;;  %v547_v56 = vcvt.s32.f32 %v531_v49 }
 0x12a   : > { %v521_v14 = vadd.s32 %v505_v12, %v1374_v31  ;;  %v338_v31 = vadd.s32 %v322_v17, %v242_v26 }
 0x12b   : > { %v474_v20 = vpop.permute.xlu1 %473 }
 0x12c   : > { %v537_v22 = vcvt.s32.f32 %v521_v14  ;;  %vm496_vm11 = vcmp.eq.s32.totalorder %v1259_v60, %v474_v20  ;;  %v434_v4 = vadd.s32 %v418_v39, %v338_v31 }
 0x12d   : > { %v512_v25 = vsel %vm496_vm11, 1, %v1027_v0 }
 0x12e   : > { %v528_v29 = vadd.s32 %v512_v25, %v432_v21  ;;  %v550_v30 = vpack.c.bf16 %v537_v22, %v536_v18 }
 0x12f   : > { %v456_v34 = vpop.permute.xlu1 %455 }
 0x130   : > { %v544_v37 = vcvt.s32.f32 %v528_v29  ;;  %vm490_vm14 = vcmp.eq.s32.totalorder %v1259_v60, %v456_v34  ;;  %866 = vmatprep.mubr.bf16.mxu0 %v550_v30 }
 0x131   : > { %v506_v38 = vsel %vm490_vm14, 1, %v1027_v0 }
 0x132   : > { %v522_v42 = vadd.s32 %v506_v38, %v1386_v41  ;;  %v554_v50 = vpack.c.bf16 %v545_v32, %v544_v37 }
 0x133   : > { %v480_v45 = vpop.permute.xlu1 %479 }
 0x134   : > { %v538_v51 = vcvt.s32.f32 %v522_v42  ;;  %vm498_vm15 = vcmp.eq.s32.totalorder %v1259_v60, %v480_v45  ;;  %874 = vmatprep.mubr.bf16.mxu1 %v554_v50 }
 0x135   : > { %v514_v53 = vsel %vm498_vm15, 1, %v1027_v0 }
 0x136   : > { %v530_v54 = vadd.s32 %v514_v53, %v434_v4  ;;  %v551_v15 = vpack.c.bf16 %v539_v47, %v538_v51 }
 0x138   : > { %v546_v57 = vcvt.s32.f32 %v530_v54  ;;  %867 = vmatmul.mubr.bf16.gmra.mrb[4].mxu0 %v551_v15 }
 0x13a   : > { %v555_v41 = vpack.c.bf16 %v547_v56, %v546_v57 }
 0x13c   : > { %875 = vmatmul.mubr.bf16.gmra.mrb[4].mxu1 %v555_v41 }
 0x1cc   : > { %v864_v27 = vpop.f32.mrb[0].mxu0 }
 0x1cd   : > { %719 = vst [vmem:[%s1465_s25 + $0x10] sm:$0xff] %v864_v27  ;;  %v654_v0 = vpop.f32.mrb[1].mxu0 }
 0x1ce   : > { %717 = vst [vmem:[%s1465_s25] sm:$0xff] %v654_v0  ;;  %v865_v60 = vpop.f32.mrb[2].mxu0 }
 0x1cf   : > { %720 = vst [vmem:[%s1465_s25 + $0x18] sm:$0xff] %v865_v60  ;;  %v657_v46 = vpop.f32.mrb[3].mxu0 }
 0x1d0   : > { %718 = vst [vmem:[%s1465_s25 + $0x8] sm:$0xff] %v657_v46  ;;  %v872_v58 = vpop.f32.mrb[0].mxu1 }
 0x1d1   : > { %727 = vst [vmem:[%s1465_s25 + $0x50] sm:$0xff] %v872_v58  ;;  %v686_v61 = vpop.f32.mrb[1].mxu1 }
 0x1d2   : > { %725 = vst [vmem:[%s1465_s25 + $0x40] sm:$0xff] %v686_v61  ;;  %v873_v48 = vpop.f32.mrb[2].mxu1 }
 0x1d3   : > { %728 = vst [vmem:[%s1465_s25 + $0x58] sm:$0xff] %v873_v48  ;;  %v689_v63 = vpop.f32.mrb[3].mxu1 }
 0x1d4   : > { %726 = vst [vmem:[%s1465_s25 + $0x48] sm:$0xff] %v689_v63 }
 0x20b   : > { %v868_v1 = vpop.f32.mrb[4].mxu0 }
 0x20c   : > { %723 = vst [vmem:[%s1465_s25 + $0x30] sm:$0xff] %v868_v1  ;;  %v670_v2 = vpop.f32.mrb[5].mxu0 }
 0x20d   : > { %721 = vst [vmem:[%s1465_s25 + $0x20] sm:$0xff] %v670_v2  ;;  %v869_v3 = vpop.f32.mrb[6].mxu0 }
 0x20e   : > { %724 = vst [vmem:[%s1465_s25 + $0x38] sm:$0xff] %v869_v3  ;;  %v673_v36 = vpop.f32.mrb[7].mxu0 }
 0x20f   : > { %722 = vst [vmem:[%s1465_s25 + $0x28] sm:$0xff] %v673_v36  ;;  %v876_v55 = vpop.f32.mrb[4].mxu1 }
 0x210   : > { %731 = vst [vmem:[%s1465_s25 + $0x70] sm:$0xff] %v876_v55  ;;  %v702_v40 = vpop.f32.mrb[5].mxu1 }
 0x211   : > { %729 = vst [vmem:[%s1465_s25 + $0x60] sm:$0xff] %v702_v40  ;;  %v877_v5 = vpop.f32.mrb[6].mxu1 }
 0x212   : > { %732 = vst [vmem:[%s1465_s25 + $0x78] sm:$0xff] %v877_v5  ;;  %v705_v6 = vpop.f32.mrb[7].mxu1 }
 0x213   : > { %730 = vst [vmem:[%s1465_s25 + $0x68] sm:$0xff] %v705_v6 }
 0x214   : > { %976 = shalt.err (!%p973_p3)
}
 0x215   : > { %s977_s7 = scalar_lea.hbm %s1485_s30, 2048  ;;  %s981_s16 = scalar_lea.hbm %s1537_s2, 4096 }
 0x216   : > { %p978_p4 = scmp.ne.s32.totalorder %s1485_s30, %s977_s7  ;;  %p982_p9 = scmp.lt.u32.totalorder %s1485_s30, %s1537_s2 }
 0x217   : > { %p983_p10 = scmp.lt.u32.totalorder %s981_s16, %s977_s7  ;;  %p985_p12 = scmp.lt.u32.totalorder %s977_s7, %s1485_s30 }
 0x218   : > { %p979_p7 = pnand %p978_p4, %p1087_p5 }
 0x219   : > { %p984_p11 = por %p983_p10, %p982_p9 }
 0x21a   : > { %p980_p8 = pneg %p979_p7 }
 0x21b   : > { %p986_p13 = por %p985_p12, %p984_p11 }
 0x21d   : > { %p987_p0 = pnand %p986_p13, %p980_p8 }
 0x21f   : > { %990 = shalt.err (!%p987_p0)
}
 0x220   : > { %s1032_s22 = smov 128   ;;  %s1033_s23 = smov 8  }
 0x221   : > { %894 = dma.vmem_to_hbm [thread:$0]  (%p1087_p5), %s1487_s27, 2048, %s1485_s30, %s1494_s13, %s1032_s22, %s1032_s22, %s1033_s23  }
 0x222 PF: > { %p900_p1 = scmp.ge.s32.totalorder %s1025_s12, 2  ;;  %s762_s24 = sand.u32 1, %s1013_s9  }
 0x223   : > { %s763_s25 = scalar_lea.sflag [#allocation3], %s762_s24 }
 0x224   : > { %p897_p2 = pnand %p900_p1, %p1091_p6 }
 0x226   : > { %1008 = dma.done.wait (!%p897_p2), %s763_s25, 2048  }
 0x227   : > { %1010 = vsyncadd (!%p897_p2), %s763_s25, 4294965248  ;;  %p12_p3 = scmp.ge.s32.totalorder %s1074_s15, 4   ;;  %s1540_s9 = smov %s1017_s10 }
 0x228   : > { %s1541_s10 = smov %s1021_s11  ;;  %s1542_s11 = smov %s1085_s18 }
 0x229   : > { %s1543_s12 = smov %s1074_s15  ;;  %14 = sbr.rel (!%p12_p3) target bundleno = 3 (0x3), region = 63 }
 0x230   :  { %768 = vsyncpa [#allocation3], 1 }
 0x231   :  { %770 = vsyncpa [#allocation3 + $0x1], 1 }

</bundles_post_ra>
